<compile_context>
chip_gen: v7x
topology: tpu7x:2x2x1
jax: 0.10.0
libtpu: 0.0.40
codegen_flags: <defaults>
</compile_context>

<pallas_src>
import jax
import jax.numpy as jnp
from jax.experimental import pallas as pl
from jax.experimental.pallas import tpu as pltpu

EPS = 1e-5


def _cbn_kernel(x_ref, gamma_ref, beta_ref, o_ref):
    # x_ref:     (N, C_BLK, HW)   feature-map block, natural NCHW-derived layout
    # gamma_ref: (N, C_BLK, 1)    per-(sample, channel) scale
    # beta_ref:  (N, C_BLK, 1)    per-(sample, channel) shift
    xf = x_ref[...].astype(jnp.float32)                    # widen in-register only
    n, _, hw = xf.shape
    inv_cnt = 1.0 / (n * hw)                               # N * H * W (biased var)

    # Per-channel batch statistics (two-pass mean/var; all channels of this
    # block are fully resident, so no cross-step accumulation is needed).
    s = jnp.sum(xf, axis=2, keepdims=True)                 # (N, C_BLK, 1) lane reduce
    mean = jnp.sum(s, axis=0, keepdims=True) * inv_cnt     # (1, C_BLK, 1)
    diff = xf - mean
    d2 = jnp.sum(diff * diff, axis=2, keepdims=True)       # (N, C_BLK, 1)
    var = jnp.sum(d2, axis=0, keepdims=True) * inv_cnt     # (1, C_BLK, 1)
    inv_std = jax.lax.rsqrt(var + EPS)                     # (1, C_BLK, 1)

    gamma = gamma_ref[...].astype(jnp.float32)             # (N, C_BLK, 1)
    beta = beta_ref[...].astype(jnp.float32)

    # Fold normalize + affine into a single per-element FMA: out = a*x + b.
    a = gamma * inv_std                                    # (N, C_BLK, 1)
    b = beta - gamma * (mean * inv_std)                    # (N, C_BLK, 1)
    o_ref[...] = (a * xf + b).astype(o_ref.dtype)


def _choose_c_block(N, C, HW, itemsize, budget_bytes=2 * 1024 * 1024):
    """Largest channel block whose x-tile (in input dtype) fits ~budget_bytes."""
    per_channel = max(N * HW * itemsize, 1)
    c_blk = budget_bytes // per_channel
    if c_blk >= C:
        return C
    if c_blk >= 8:
        return int((c_blk // 8) * 8)          # keep a multiple of 8 (f32 sublane)
    # TODO(synk): for very large per-channel slabs (N*H*W too big for one block),
    # switch to a two-pass grid over HW chunks with a VMEM sum/sumsq accumulator.
    return min(8, C)


@jax.jit
def conditional_batch_norm_2d(x, y, embed_weight):
    """x: (N, C, H, W), y: (N,) int32, embed_weight: (num_classes, 2*C)."""
    N, C, H, W = x.shape
    HW = H * W

    # Embedding lookup + chunk(2, dim=1)  (tiny; plain-JAX glue).
    emb = embed_weight[y]                             # (N, 2*C)
    gamma = emb[:, :C][:, :, None]                    # (N, C, 1) natural layout
    beta = emb[:, C:][:, :, None]                     # (N, C, 1)

    # Free view of contiguous NCHW — no transpose, no extra HBM traffic.
    x_v = x.reshape(N, C, HW)

    c_blk = _choose_c_block(N, C, HW, x.dtype.itemsize)
    grid = (pl.cdiv(C, c_blk),)

    out = pl.pallas_call(
        _cbn_kernel,
        out_shape=jax.ShapeDtypeStruct((N, C, HW), x.dtype),
        grid_spec=pltpu.PrefetchScalarGridSpec(
            num_scalar_prefetch=0,
            grid=grid,
            in_specs=[
                pl.BlockSpec((N, c_blk, HW), lambda c: (0, c, 0)),
                pl.BlockSpec((N, c_blk, 1), lambda c: (0, c, 0)),
                pl.BlockSpec((N, c_blk, 1), lambda c: (0, c, 0)),
            ],
            out_specs=pl.BlockSpec((N, c_blk, HW), lambda c: (0, c, 0)),
        ),
        compiler_params=pltpu.CompilerParams(
            dimension_semantics=("parallel",),          # shards over 2 TCs on v7x
            vmem_limit_bytes=32 * 1024 * 1024,          # headroom on v7x's 64 MiB
        ),
    )(x_v, gamma, beta)

    return out.reshape(N, C, H, W)


def init_params(key, num_features, num_classes):
    """Deterministic init matching the module's __init__."""
    # embed.weight[:, :num_features] ~ Normal(1, 0.02); rest zeros.
    (k_gamma,) = jax.random.split(key, 1)
    gamma_part = 1.0 + 0.02 * jax.random.normal(
        k_gamma, (num_classes, num_features), dtype=jnp.float32)
    beta_part = jnp.zeros((num_classes, num_features), dtype=jnp.float32)
    return jnp.concatenate([gamma_part, beta_part], axis=1)   # (num_classes, 2*C)


def _reference(x, y, embed_weight):
    """Pure-JAX reference for the same forward pass (training-mode BN)."""
    N, C, H, W = x.shape
    mean = jnp.mean(x, axis=(0, 2, 3), keepdims=True)
    var = jnp.mean((x - mean) ** 2, axis=(0, 2, 3), keepdims=True)
    x_hat = (x - mean) / jnp.sqrt(var + EPS)
    emb = embed_weight[y]
    gamma = emb[:, :C].reshape(N, C, 1, 1)
    beta = emb[:, C:].reshape(N, C, 1, 1)
    return gamma * x_hat + beta


if __name__ == "__main__":
    num_features = 4
    num_classes = 10
    N, H, W = 2, 16, 16

    key = jax.random.PRNGKey(0)
    kx, ky, kp = jax.random.split(key, 3)

    x = jax.random.normal(kx, (N, num_features, H, W), dtype=jnp.float32)
    y = jax.random.randint(ky, (N,), 0, num_classes, dtype=jnp.int32)
    embed_weight = init_params(kp, num_features, num_classes)

    out = conditional_batch_norm_2d(x, y, embed_weight)
    out = jax.block_until_ready(out)

    ref = _reference(x, y, embed_weight)
    assert out.shape == (N, num_features, H, W)
    assert jnp.allclose(out, ref, atol=1e-4, rtol=1e-4)

    # TODO(synk): running_mean/running_var updates (training side effect of
    # nn.BatchNorm2d) and eval-mode (running-stats) normalization are not
    # implemented; only the forward activation path is reproduced.

    print("KERNEL_OK")
</pallas_src>

<mosaic_0001>
module attributes {stable_mosaic.version = 11 : i64} {
  func.func @_cbn_kernel(%arg0: i32, %arg1: memref<2x4x256xf32, #tpu.memory_space<vmem>>, %arg2: memref<2x4x1xf32, #tpu.memory_space<vmem>>, %arg3: memref<2x4x1xf32, #tpu.memory_space<vmem>>, %arg4: memref<2x4x256xf32, #tpu.memory_space<vmem>>) attributes {dimension_semantics = [#tpu.dimension_semantics<parallel>], iteration_bounds = array<i64: 1>, scalar_prefetch = 0 : i64, scratch_operands = 0 : i64, tpu.core_type = #tpu.core_type<tc>, window_params = [{transform_indices = @transform_0, window_bounds = array<i64: 2, 4, 256>}, {transform_indices = @transform_1, window_bounds = array<i64: 2, 4, 1>}, {transform_indices = @transform_2, window_bounds = array<i64: 2, 4, 1>}, {transform_indices = @transform_3, window_bounds = array<i64: 2, 4, 256>}]} {
    %c0 = arith.constant 0 : index
    %c0_0 = arith.constant 0 : index
    %c0_1 = arith.constant 0 : index
    %0 = vector.load %arg1[%c0, %c0_0, %c0_1] : memref<2x4x256xf32, #tpu.memory_space<vmem>>, vector<2x4x256xf32>
    %cst = arith.constant dense<0.000000e+00> : vector<2x4xf32>
    %1 = vector.multi_reduction <add>, %0, %cst [2] : vector<2x4x256xf32> to vector<2x4xf32>
    %2 = vector.shape_cast %1 : vector<2x4xf32> to vector<2x4x1xf32>
    %cst_2 = arith.constant dense<0.000000e+00> : vector<4x1xf32>
    %3 = vector.multi_reduction <add>, %2, %cst_2 [0] : vector<2x4x1xf32> to vector<4x1xf32>
    %4 = vector.shape_cast %3 : vector<4x1xf32> to vector<1x4x1xf32>
    %cst_3 = arith.constant 0.001953125 : f32
    %5 = vector.broadcast %cst_3 : f32 to vector<1x4x1xf32>
    %6 = arith.mulf %4, %5 : vector<1x4x1xf32>
    %7 = vector.broadcast %6 : vector<1x4x1xf32> to vector<2x4x256xf32>
    %8 = arith.subf %0, %7 : vector<2x4x256xf32>
    %9 = arith.mulf %8, %8 : vector<2x4x256xf32>
    %cst_4 = arith.constant dense<0.000000e+00> : vector<2x4xf32>
    %10 = vector.multi_reduction <add>, %9, %cst_4 [2] : vector<2x4x256xf32> to vector<2x4xf32>
    %11 = vector.shape_cast %10 : vector<2x4xf32> to vector<2x4x1xf32>
    %cst_5 = arith.constant dense<0.000000e+00> : vector<4x1xf32>
    %12 = vector.multi_reduction <add>, %11, %cst_5 [0] : vector<2x4x1xf32> to vector<4x1xf32>
    %13 = vector.shape_cast %12 : vector<4x1xf32> to vector<1x4x1xf32>
    %cst_6 = arith.constant 0.001953125 : f32
    %14 = vector.broadcast %cst_6 : f32 to vector<1x4x1xf32>
    %15 = arith.mulf %13, %14 : vector<1x4x1xf32>
    %cst_7 = arith.constant 9.99999974E-6 : f32
    %16 = vector.broadcast %cst_7 : f32 to vector<1x4x1xf32>
    %17 = arith.addf %15, %16 : vector<1x4x1xf32>
    %18 = math.rsqrt %17 : vector<1x4x1xf32>
    %c0_8 = arith.constant 0 : index
    %c0_9 = arith.constant 0 : index
    %c0_10 = arith.constant 0 : index
    %19 = vector.load %arg2[%c0_8, %c0_9, %c0_10] : memref<2x4x1xf32, #tpu.memory_space<vmem>>, vector<2x4x1xf32>
    %c0_11 = arith.constant 0 : index
    %c0_12 = arith.constant 0 : index
    %c0_13 = arith.constant 0 : index
    %20 = vector.load %arg3[%c0_11, %c0_12, %c0_13] : memref<2x4x1xf32, #tpu.memory_space<vmem>>, vector<2x4x1xf32>
    %21 = vector.broadcast %18 : vector<1x4x1xf32> to vector<2x4x1xf32>
    %22 = arith.mulf %19, %21 : vector<2x4x1xf32>
    %23 = arith.mulf %6, %18 : vector<1x4x1xf32>
    %24 = vector.broadcast %23 : vector<1x4x1xf32> to vector<2x4x1xf32>
    %25 = arith.mulf %19, %24 : vector<2x4x1xf32>
    %26 = arith.subf %20, %25 : vector<2x4x1xf32>
    %27 = vector.broadcast %22 : vector<2x4x1xf32> to vector<2x4x256xf32>
    %28 = arith.mulf %27, %0 : vector<2x4x256xf32>
    %29 = vector.broadcast %26 : vector<2x4x1xf32> to vector<2x4x256xf32>
    %30 = arith.addf %28, %29 : vector<2x4x256xf32>
    %c0_14 = arith.constant 0 : index
    %c0_15 = arith.constant 0 : index
    %c0_16 = arith.constant 0 : index
    %31 = vector.load %arg4[%c0_14, %c0_15, %c0_16] : memref<2x4x256xf32, #tpu.memory_space<vmem>>, vector<2x4x256xf32>
    tpu.vector_store %arg4[%c0_14, %c0_15, %c0_16], %30 {strides = array<i32>} : memref<2x4x256xf32, #tpu.memory_space<vmem>>, vector<2x4x256xf32>,
    return
  }
  func.func @transform_0(%arg0: i32) -> (i32, i32, i32) {
    %c0_i32 = arith.constant 0 : i32
    %c0_i32_0 = arith.constant 0 : i32
    %c0_i32_1 = arith.constant 0 : i32
    return %c0_i32, %arg0, %c0_i32_0 : i32, i32, i32
  }
  func.func @transform_1(%arg0: i32) -> (i32, i32, i32) {
    %c0_i32 = arith.constant 0 : i32
    %c0_i32_0 = arith.constant 0 : i32
    %c0_i32_1 = arith.constant 0 : i32
    return %c0_i32, %arg0, %c0_i32_0 : i32, i32, i32
  }
  func.func @transform_2(%arg0: i32) -> (i32, i32, i32) {
    %c0_i32 = arith.constant 0 : i32
    %c0_i32_0 = arith.constant 0 : i32
    %c0_i32_1 = arith.constant 0 : i32
    return %c0_i32, %arg0, %c0_i32_0 : i32, i32, i32
  }
  func.func @transform_3(%arg0: i32) -> (i32, i32, i32) {
    %c0_i32 = arith.constant 0 : i32
    %c0_i32_0 = arith.constant 0 : i32
    %c0_i32_1 = arith.constant 0 : i32
    return %c0_i32, %arg0, %c0_i32_0 : i32, i32, i32
  }
}

</mosaic_0001>

<bundles_post_ra>
// kernel: conditional_batch_norm_2d.1
= control target key start
LH: loop header
LB: loop body
LE: loop exit
PB: predicated region body
PF: predicated region fallthrough
CT: control target
= control target key end

     0   :  { %vm22_vm0 = vcmask 1043456   ;;  %v133_v10 = vmov 839922192   ;;  %v41_v12 = vlaneseq  ;;  %v134_v35 = vmov 0   ;;  %s213_s0 = inlined_call_operand.vmem [shape: f32[2,4,256], index: 0, kind: input, shape index: {}]   ;;  %s214_s1 = inlined_call_operand.vmem [shape: f32[2,4,1], index: 1, kind: input, shape index: {}]   ;;  %s215_s2 = inlined_call_operand.vmem [shape: f32[2,4,1], index: 2, kind: input, shape index: {}]   ;;  %s216_s3 = inlined_call_operand.vmem [shape: f32[2,4,256], index: 3, kind: output, shape index: {}]  }
   0x1   :  { %v158_v0 = vld [vmem:[%s213_s0] sm:$0xff]  ;;  %v163_v1 = vld [vmem:[%s213_s0 + $0x8] sm:$0xff]  ;;  %v39_v11 = vunpack.c.l.s4 %v133_v10  ;;  %128 = vset.pattern.permute.xlu1 %v134_v35  ;;  %127 = vset.pattern.permute.xlu0 %v134_v35 }
   0x2   :  { %v167_v2 = vcombine.high %v158_v0, %v158_v0  ;;  %v23_v3 = vsel %vm22_vm0, %v158_v0, 0.0  ;;  %v173_v4 = vcombine.high %v163_v1, %v163_v1  ;;  %v28_v6 = vsel %vm22_vm0, %v163_v1, 0.0  ;;  %v73_v43 = vld [vmem:[%s214_s1 + $0x4] sm:$0xf]  ;;  %v72_v44 = vld [vmem:[%s214_s1] sm:$0xf] }
   0x3   :  { %v40_v14 = vunpack.c.0.s8 %v39_v11  ;;  %v42_v15 = vshrl.u32 %v41_v12, 7  ;;  %v74_v49 = vld [vmem:[%s215_s2] sm:$0xf]  ;;  %v75_v53 = vld [vmem:[%s215_s2 + $0x4] sm:$0xf] }
   0x4   :  { %v24_v5 = vsel %vm22_vm0, %v167_v2, 0.0  ;;  %v29_v7 = vsel %vm22_vm0, %v173_v4, 0.0 }
   0x5   :  { %v25_v8 = vadd.f32 %v24_v5, %v23_v3  ;;  %v30_v9 = vadd.f32 %v29_v7, %v28_v6  ;;  %v43_v19 = vsub.s32 %v40_v14, %v42_v15 }
   0x7   :  { %26 = vadd.xlane.f32.xlu0 %v25_v8 }
   0xb   :  { %31 = vadd.xlane.f32.xlu0 %v30_v9 }
  0x94   :  { %v27_v13 = vpop.xlane.xlu0 %26 }
  0x95   :  { %v33_v17 = vsel %vm22_vm0, %v27_v13, 0.0 }
  0x98   :  { %v32_v16 = vpop.xlane.xlu0 %31 }
  0x99   :  { %v34_v18 = vsel %vm22_vm0, %v32_v16, 0.0 }
  0x9a   :  { %v35_v20 = vadd.f32 %v34_v18, %v33_v17 }
  0x9c   :  { %v36_v21 = vmul.f32 0.001953125, %v35_v20 }
  0x9e   :  { %v44_v22 = vrot.slane %v36_v21, %v43_v19 }
  0xa0   :  { %v46_v23 = vsub.f32 %v158_v0, %v44_v22  ;;  %v47_v24 = vsub.f32 %v163_v1, %v44_v22 }
  0xa2   :  { %v48_v25 = vmul.f32 %v46_v23, %v46_v23  ;;  %v49_v26 = vmul.f32 %v47_v24, %v47_v24 }
  0xa4   :  { %v52_v27 = vcombine.high %v48_v25, %v48_v25  ;;  %v53_v28 = vcombine.high %v49_v26, %v49_v26  ;;  %v56_v29 = vsel %vm22_vm0, %v48_v25, 0.0  ;;  %v61_v33 = vsel %vm22_vm0, %v49_v26, 0.0 }
  0xa6   :  { %v57_v30 = vsel %vm22_vm0, %v52_v27, 0.0  ;;  %v62_v32 = vsel %vm22_vm0, %v53_v28, 0.0 }
  0xa7   :  { %v58_v31 = vadd.f32 %v57_v30, %v56_v29  ;;  %v63_v34 = vadd.f32 %v62_v32, %v61_v33 }
  0xa9   :  { %59 = vadd.xlane.f32.xlu1 %v58_v31 }
  0xad   :  { %64 = vadd.xlane.f32.xlu1 %v63_v34 }
 0x136   :  { %v60_v36 = vpop.xlane.xlu1 %59 }
 0x137   :  { %v66_v38 = vsel %vm22_vm0, %v60_v36, 0.0 }
 0x13a   :  { %v65_v37 = vpop.xlane.xlu1 %64 }
 0x13b   :  { %v67_v39 = vsel %vm22_vm0, %v65_v37, 0.0 }
 0x13c   :  { %v68_v40 = vadd.f32 %v67_v39, %v66_v38 }
 0x13e   :  { %v69_v41 = vmul.f32 0.001953125, %v68_v40 }
 0x140   :  { %v70_v42 = vadd.f32 1e-05, %v69_v41 }
 0x142   :  { %131 = vrsqrt.f32 %v70_v42 }
 0x14c   :  { %v132_v45 = vpop.eup %131 }
 0x14d   :  { %v77_v46 = vmul.f32 %v132_v45, %v73_v43  ;;  %v76_v47 = vmul.f32 %v132_v45, %v72_v44  ;;  %v78_v48 = vmul.f32 %v132_v45, %v36_v21 }
 0x14f   :  { %90 = vperm.xlu1 %128, %v77_v46   ;;  %85 = vperm.xlu0 %127, %v76_v47   ;;  %v79_v50 = vmul.f32 %v78_v48, %v72_v44  ;;  %v80_v52 = vmul.f32 %v78_v48, %v73_v43 }
 0x151   :  { %v81_v51 = vsub.f32 %v74_v49, %v79_v50  ;;  %v82_v54 = vsub.f32 %v75_v53, %v80_v52 }
 0x153   :  { %99 = vperm.xlu1 %128, %v81_v51  }
 0x157   :  { %104 = vperm.xlu1 %128, %v82_v54  }
 0x1ce   :  { %v91_v55 = vpop.permute.xlu1 %90  ;;  %v86_v56 = vpop.permute.xlu0 %85 }
 0x1cf   :  { %v93_v57 = vmul.f32 %v86_v56, %v158_v0  ;;  %v94_v58 = vmul.f32 %v86_v56, %v167_v2  ;;  %v95_v62 = vmul.f32 %v91_v55, %v163_v1  ;;  %v96_v63 = vmul.f32 %v91_v55, %v173_v4 }
 0x1d2   :  { %v100_v59 = vpop.permute.xlu1 %99 }
 0x1d3   :  { %v107_v60 = vadd.f32 %v100_v59, %v93_v57  ;;  %v108_v61 = vadd.f32 %v100_v59, %v94_v58 }
 0x1d5   :  { %v115_v3 = vcombine.low %v107_v60, %v108_v61 }
 0x1d6   :  { %v105_v5 = vpop.permute.xlu1 %104 }
 0x1d7   :  { %v109_v6 = vadd.f32 %v105_v5, %v95_v62  ;;  %v110_v7 = vadd.f32 %v105_v5, %v96_v63  ;;  %119 = vst [vmem:[%s216_s3] sm:$0xff] %v115_v3 }
 0x1d9   :  { %v116_v8 = vcombine.low %v109_v6, %v110_v7 }
 0x1db   :  { %120 = vst [vmem:[%s216_s3 + $0x8] sm:$0xff] %v116_v8 }

</bundles_post_ra>
